<compile_context>
chip_gen: v5e
topology: v5e:2x2
jax: 0.10.0
libtpu: 0.0.40
codegen_flags: <defaults>
</compile_context>

<pallas_src>
import functools

import jax
import jax.numpy as jnp
from jax import lax
from jax.experimental import pallas as pl
from jax.experimental.pallas import tpu as pltpu

_LANES = 128
_SUBLANES = 8
# Combined bytes of both input blocks fetched per grid step (~4 MiB/input).
_TARGET_STEP_BYTES = 8 << 20
# 2 inputs x 2 pipeline buffers x <=4 MiB = <=16 MiB + output + headroom.
# Fits v5e/v6e (128 MiB phys) and v7x (64 MiB phys per TC).
_VMEM_LIMIT_BYTES = 32 << 20
# Trailing dims larger than this fall back to the (rare) pad path so a single
# row can never blow the VMEM block budget.
_MAX_LANE_DIM = 16384


def _num_tensorcores():
    """2 on v7x-class chips (2 TCs visible to one Pallas program), else 1."""
    try:
        kind = jax.devices()[0].device_kind.lower()
    except Exception:
        return 1
    return 2 if ("v7" in kind or "7x" in kind) else 1


def _as_2d(x):
    """Free (layout-preserving) 2-D view of x; pads only in a rare fallback."""
    n = x.size
    if n % _LANES == 0:
        return x.reshape(n // _LANES, _LANES)
    last = x.shape[-1] if x.ndim else 1
    if last <= _MAX_LANE_DIM:
        # Collapse leading dims; trailing dim equals the full array dim, so it
        # is exempt from the 128-lane block rule. No HBM copy.
        return x.reshape(n // last, last)
    # TODO(synk): rare fallback (huge, 128-unaligned trailing dim) -- minimal
    # zero pad; padded zeros contribute (0-0)^2 = 0 to the sum.
    pad = (-n) % _LANES
    return jnp.pad(x.reshape(-1), (0, pad)).reshape(-1, _LANES)


def _mse_sum_kernel(p_ref, t_ref, o_ref, *, rows, tile_rows, steps_per_core,
                    needs_mask, out_sub):
    """Accumulates sum((p - t)^2) into a small resident output slab per core."""
    c = pl.program_id(0)
    s = pl.program_id(1)

    @pl.when(s == 0)
    def _init():
        o_ref[...] = jnp.zeros_like(o_ref)

    lanes = p_ref.shape[-1]
    d = p_ref[...].astype(jnp.float32) - t_ref[...].astype(jnp.float32)
    sq = d * d                                     # (tile_rows, lanes)

    def fold(x):
        if out_sub == _SUBLANES:
            # (tile_rows, lanes) -> (groups, 8, lanes), sum over groups:
            # pure VPU elementwise adds; cross-lane reduce deferred to wrapper.
            return jnp.sum(
                x.reshape(tile_rows // _SUBLANES, _SUBLANES, lanes), axis=0)
        # Single full-extent tile whose row count is not a multiple of 8.
        return jnp.sum(x, axis=0, keepdims=True)

    if not needs_mask:
        o_ref[0] += fold(sq)
    else:
        row_start = (c * steps_per_core + s) * tile_rows
        is_partial = row_start + tile_rows > rows

        @pl.when(jnp.logical_not(is_partial))
        def _full_tile():
            o_ref[0] += fold(sq)

        @pl.when(is_partial)
        def _ragged_tile():
            # Mask garbage rows of the partial (or clamped duplicate) tile.
            # Select (NOT multiply-by-mask) so OOB NaN/Inf cannot propagate.
            rid = row_start + lax.broadcasted_iota(
                jnp.int32, (tile_rows, 1), 0)
            o_ref[0] += fold(jnp.where(rid < rows, sq, 0.0))


def mean_square_error(predictions, targets, weight=None, *,
                      _max_step_bytes=None):
    """Matches MeanSquareError.forward for the weight=None path."""
    if weight is not None:
        # TODO(synk): the PyTorch weighted branch references an undefined
        # variable `pred` upstream (buggy); only weight=None is supported.
        raise NotImplementedError("weighted path not supported")

    assert predictions.shape == targets.shape
    shape = predictions.shape
    n = predictions.size

    # norm_term = prod(spatial dims 2:) * batch (dim 0); channel dim excluded
    # on purpose to match the PyTorch reference.
    spatial = 1.0
    for sdim in shape[2:]:
        spatial *= float(sdim)
    norm_term = jnp.float32(spatial * float(shape[0]))

    p2 = _as_2d(predictions)
    t2 = _as_2d(targets)
    rows, lanes = p2.shape

    # Row-tile sizing: biggest block with combined (p, t) bytes <= target.
    step_bytes = _max_step_bytes or _TARGET_STEP_BYTES
    bytes_per_row = lanes * (p2.dtype.itemsize + t2.dtype.itemsize)
    cap = max(1, step_bytes // bytes_per_row)
    cap32 = (cap // 32) * 32        # keep packed bf16/int8 sublane rows native
    cap_rows = cap32 if cap32 >= 32 else max(
        _SUBLANES, (cap // _SUBLANES) * _SUBLANES)

    if rows <= cap_rows:
        tile_rows = rows            # single full-extent tile (bypasses 8-rule)
    else:
        tile_rows = cap_rows        # multiple of 8, >= 8

    num_tiles = pl.cdiv(rows, tile_rows)
    ncores = _num_tensorcores() if num_tiles >= 2 else 1
    spc = pl.cdiv(num_tiles, ncores)          # grid steps per core
    needs_mask = (num_tiles * tile_rows != rows) or (ncores * spc != num_tiles)
    out_sub = _SUBLANES if tile_rows % _SUBLANES == 0 else 1

    def in_map(c, s):
        # Clamp to a valid tile; clamped duplicates are fully masked in-kernel.
        return (jnp.minimum(c * spc + s, num_tiles - 1), 0)

    kernel = functools.partial(
        _mse_sum_kernel, rows=rows, tile_rows=tile_rows, steps_per_core=spc,
        needs_mask=needs_mask, out_sub=out_sub)

    out_bytes = ncores * out_sub * lanes * 4
    cost = pl.CostEstimate(
        flops=3 * n, transcendentals=0,
        bytes_accessed=n * (p2.dtype.itemsize + t2.dtype.itemsize) + out_bytes)

    def launch(dim_sems):
        return pl.pallas_call(
            kernel,
            out_shape=jax.ShapeDtypeStruct((ncores, out_sub, lanes),
                                           jnp.float32),
            grid_spec=pltpu.PrefetchScalarGridSpec(
                num_scalar_prefetch=0,
                grid=(ncores, spc),
                in_specs=[
                    pl.BlockSpec((tile_rows, lanes), in_map),
                    pl.BlockSpec((tile_rows, lanes), in_map),
                ],
                out_specs=pl.BlockSpec((1, out_sub, lanes),
                                       lambda c, s: (c, 0, 0)),
            ),
            compiler_params=pltpu.CompilerParams(
                dimension_semantics=dim_sems,
                vmem_limit_bytes=_VMEM_LIMIT_BYTES),
            cost_estimate=cost,
        )(p2, t2)

    if ncores > 1:
        try:
            # Explicit core-parallel split so both v7x TensorCores stream HBM.
            partials = launch((pltpu.CORE_PARALLEL, pltpu.ARBITRARY))
        except Exception:
            partials = launch(("parallel", "arbitrary"))
    else:
        partials = launch(("arbitrary", "arbitrary"))

    # Tiny final cross-lane reduce of the per-core partial-sum slabs.
    return jnp.sum(partials) / norm_term


if __name__ == "__main__":
    key = jax.random.PRNGKey(0)
    k1, k2, k3, k4 = jax.random.split(key, 4)

    # Small NCHW case: batch=2, channels=4, spatial=16x16
    # (128-aligned -> dense (16, 128) view, single tile, no mask).
    preds = jax.random.normal(k1, (2, 4, 16, 16), dtype=jnp.float32)
    targs = jax.random.normal(k2, (2, 4, 16, 16), dtype=jnp.float32)
    out = jax.block_until_ready(mean_square_error(preds, targs))
    ref = jnp.sum((preds - targs) ** 2) / (float(16 * 16) * 2.0)
    assert jnp.allclose(out, ref, rtol=1e-4, atol=1e-5), (out, ref)

    # 128-unaligned case: exercises the pad-free (prod(leading), last-dim)
    # view (rows=1440, lanes=185), single big tile, no mask, no jnp.pad.
    preds2 = jax.random.normal(k3, (2, 4, 180, 185), dtype=jnp.float32)
    targs2 = jax.random.normal(k4, (2, 4, 180, 185), dtype=jnp.float32)
    out2 = jax.block_until_ready(mean_square_error(preds2, targs2))
    ref2 = jnp.sum((preds2 - targs2) ** 2) / (float(180 * 185) * 2.0)
    assert jnp.allclose(out2, ref2, rtol=1e-4, atol=1e-4), (out2, ref2)

    # Same data with a small forced per-step budget: multi-tile grid with a
    # ragged last tile -> exercises the pl.when-gated in-kernel row mask.
    out3 = jax.block_until_ready(
        mean_square_error(preds2, targs2, _max_step_bytes=300 * 1024))
    assert jnp.allclose(out3, ref2, rtol=1e-4, atol=1e-4), (out3, ref2)

    print("KERNEL_OK")
</pallas_src>

<mosaic_0001>
module attributes {stable_mosaic.version = 11 : i64} {
  func.func @_mse_sum_kernel(%arg0: i32, %arg1: i32, %arg2: memref<16x128xf32, #tpu.memory_space<vmem>>, %arg3: memref<16x128xf32, #tpu.memory_space<vmem>>, %arg4: memref<1x8x128xf32, #tpu.memory_space<vmem>>) attributes {dimension_semantics = [#tpu.dimension_semantics<arbitrary>, #tpu.dimension_semantics<arbitrary>], iteration_bounds = array<i64: 1, 1>, scalar_prefetch = 0 : i64, scratch_operands = 0 : i64, tpu.core_type = #tpu.core_type<tc>, window_params = [{transform_indices = @transform_0, window_bounds = array<i64: 16, 128>}, {transform_indices = @transform_1, window_bounds = array<i64: 16, 128>}, {transform_indices = @transform_2, window_bounds = array<i64: 1, 8, 128>}]} {
    %c0_i32 = arith.constant 0 : i32
    %0 = arith.cmpi eq, %arg1, %c0_i32 : i32
    %1 = arith.extui %0 : i1 to i32
    %c0_i32_0 = arith.constant 0 : i32
    %2 = arith.cmpi ne, %1, %c0_i32_0 : i32
    scf.if %2 {
      %cst_10 = arith.constant 0.000000e+00 : f32
      %15 = vector.broadcast %cst_10 : f32 to vector<1x8x128xf32>
      %c0_11 = arith.constant 0 : index
      %c0_12 = arith.constant 0 : index
      %c0_13 = arith.constant 0 : index
      %16 = vector.load %arg4[%c0_11, %c0_12, %c0_13] : memref<1x8x128xf32, #tpu.memory_space<vmem>>, vector<1x8x128xf32>
      tpu.vector_store %arg4[%c0_11, %c0_12, %c0_13], %15 {strides = array<i32>} : memref<1x8x128xf32, #tpu.memory_space<vmem>>, vector<1x8x128xf32>,
    } else {
    }
    %c0 = arith.constant 0 : index
    %c0_1 = arith.constant 0 : index
    %3 = vector.load %arg2[%c0, %c0_1] : memref<16x128xf32, #tpu.memory_space<vmem>>, vector<16x128xf32>
    %c0_2 = arith.constant 0 : index
    %c0_3 = arith.constant 0 : index
    %4 = vector.load %arg3[%c0_2, %c0_3] : memref<16x128xf32, #tpu.memory_space<vmem>>, vector<16x128xf32>
    %5 = arith.subf %3, %4 : vector<16x128xf32>
    %6 = arith.mulf %5, %5 : vector<16x128xf32>
    %c0_4 = arith.constant 0 : index
    %c0_5 = arith.constant 0 : index
    %c0_6 = arith.constant 0 : index
    %7 = vector.load %arg4[%c0_4, %c0_5, %c0_6] : memref<1x8x128xf32, #tpu.memory_space<vmem>>, vector<1x8x128xf32>
    %8 = vector.shape_cast %7 : vector<1x8x128xf32> to vector<8x128xf32>
    %9 = vector.shape_cast %6 : vector<16x128xf32> to vector<2x8x128xf32>
    %cst = arith.constant dense<0.000000e+00> : vector<8x128xf32>
    %10 = vector.multi_reduction <add>, %9, %cst [0] : vector<2x8x128xf32> to vector<8x128xf32>
    %11 = arith.addf %8, %10 : vector<8x128xf32>
    %c0_7 = arith.constant 0 : index
    %c0_8 = arith.constant 0 : index
    %c0_9 = arith.constant 0 : index
    %12 = vector.load %arg4[%c0_7, %c0_8, %c0_9] : memref<1x8x128xf32, #tpu.memory_space<vmem>>, vector<1x8x128xf32>
    %13 = vector.shape_cast %12 : vector<1x8x128xf32> to vector<8x128xf32>
    %14 = vector.shape_cast %11 : vector<8x128xf32> to vector<1x8x128xf32>
    tpu.vector_store %arg4[%c0_7, %c0_8, %c0_9], %14 {strides = array<i32>} : memref<1x8x128xf32, #tpu.memory_space<vmem>>, vector<1x8x128xf32>,
    return
  }
  func.func @transform_0(%arg0: i32, %arg1: i32) -> (i32, i32) {
    %c1_i32 = arith.constant 1 : i32
    %0 = arith.muli %arg0, %c1_i32 : i32
    %1 = arith.addi %0, %arg1 : i32
    %c0_i32 = arith.constant 0 : i32
    %2 = arith.minsi %1, %c0_i32 : i32
    %c0_i32_0 = arith.constant 0 : i32
    %c0_i32_1 = arith.constant 0 : i32
    return %2, %c0_i32_0 : i32, i32
  }
  func.func @transform_1(%arg0: i32, %arg1: i32) -> (i32, i32) {
    %c1_i32 = arith.constant 1 : i32
    %0 = arith.muli %arg0, %c1_i32 : i32
    %1 = arith.addi %0, %arg1 : i32
    %c0_i32 = arith.constant 0 : i32
    %2 = arith.minsi %1, %c0_i32 : i32
    %c0_i32_0 = arith.constant 0 : i32
    %c0_i32_1 = arith.constant 0 : i32
    return %2, %c0_i32_0 : i32, i32
  }
  func.func @transform_2(%arg0: i32, %arg1: i32) -> (i32, i32, i32) {
    %c0_i32 = arith.constant 0 : i32
    %c0_i32_0 = arith.constant 0 : i32
    %c0_i32_1 = arith.constant 0 : i32
    return %arg0, %c0_i32, %c0_i32_0 : i32, i32, i32
  }
}

</mosaic_0001>

<bundles_post_ra>
// kernel: tpu_custom_call.1
= control target key start
LH: loop header
LB: loop body
LE: loop exit
PB: predicated region body
PF: predicated region fallthrough
CT: control target
= control target key end

     0   :  { %7 = vsyncpa [#allocation3], 0  ;;  %s216_s0 = inlined_call_operand.hbm [shape: f32[16,128], index: 0, kind: input, shape index: {}]   ;;  %s217_s1 = inlined_call_operand.hbm [shape: f32[16,128], index: 1, kind: input, shape index: {}]   ;;  %s218_s2 = inlined_call_operand.hbm [shape: f32[1,8,128], index: 2, kind: output, shape index: {}]  }
   0x1   :  { %8 = vsyncpa [#allocation6], 0 }
   0x2   :  { %9 = vsyncpa [#allocation4], 0  ;;  %s20_s11 = sshll.u32 %s216_s0, 4  ;;  %s187_s12 = smov [#allocation2]   ;;  %s21_s11 = int_to_ptr.hbm [resolvable:$true] %s20_s11 }
   0x3   :  { %s22_s13 = sshll.u32 %s187_s12, 4  ;;  %s39_s16 = sshll.u32 %s217_s1, 4  ;;  %s23_s13 = int_to_ptr.vmem [resolvable:$true] %s22_s13  ;;  %s40_s16 = int_to_ptr.hbm [resolvable:$true] %s39_s16 }
   0x4   :  { %s188_s17 = smov 128   ;;  %s189_s18 = smov 8  }
   0x5   :  { %28 = dma.hbm_to_vmem [thread:$0]  %s21_s11, 256, %s23_s13, [#allocation3], %s188_s17, %s188_s17, %s189_s18  }
   0x6   :  { %s190_s19 = smov [#allocation5]  }
   0x7   :  { %s41_s20 = sshll.u32 %s190_s19, 4  ;;  %s42_s20 = int_to_ptr.vmem [resolvable:$true] %s41_s20 }
   0x8   :  { %47 = dma.hbm_to_vmem [thread:$0]  %s40_s16, 256, %s42_s20, [#allocation6], %s188_s17, %s188_s17, %s189_s18  }
   0x9   :  { %181 = dma.done.wait [#allocation3], 256  }
   0xa   :  { %182 = vsyncadd [#allocation3], 4294967040 }
   0xb   :  { %183 = dma.done.wait [#allocation6], 256  }
   0xc   :  { %184 = vsyncadd [#allocation6], 4294967040  ;;  %v69_v0 = vld [vmem:[#allocation2] sm:$0xff]  ;;  %v70_v1 = vld [vmem:[#allocation2 + $0x8] sm:$0xff]  ;;  %s191_s0 = smov [#allocation7]   ;;  %s88_s23 = sshll.u32 %s218_s2, 4  ;;  %s89_s23 = int_to_ptr.hbm [resolvable:$true] %s88_s23 }
   0xd   :  { %v71_v2 = vld [vmem:[#allocation5] sm:$0xff]  ;;  %v72_v3 = vld [vmem:[#allocation5 + $0x8] sm:$0xff]  ;;  %s86_s1 = sshll.u32 %s191_s0, 4  ;;  %s87_s1 = int_to_ptr.vmem [resolvable:$true] %s86_s1 }
   0xe   :  { %v73_v4 = vsub.f32 %v69_v0, %v71_v2  ;;  %v74_v5 = vsub.f32 %v70_v1, %v72_v3 }
  0x10   :  { %v75_v6 = vmul.f32 %v73_v4, %v73_v4  ;;  %v76_v7 = vmul.f32 %v74_v5, %v74_v5 }
  0x12   :  { %v78_v8 = vadd.f32 %v76_v7, %v75_v6 }
  0x14   :  { %80 = vst [vmem:[#allocation7] sm:$0xff] %v78_v8 }
  0x15   :  { %91 = dma.vmem_to_hbm [thread:$0]  %s87_s1, 128, %s89_s23, [#allocation4]  }
  0x16   :  { %185 = dma.done.wait [#allocation4], 128  }
  0x17   :  { %186 = vsyncadd [#allocation4], 4294967168 }
  0x18   :  { %96 = vsyncpa [#allocation3], 1 }
  0x19   :  { %97 = vsyncpa [#allocation6], 1 }
  0x1a   :  { %98 = vsyncpa [#allocation4], 1 }

</bundles_post_ra>
